<compile_context>
chip_gen: v7x
topology: tpu7x:2x2x1
jax: 0.10.0
libtpu: 0.0.40
codegen_flags: <defaults>
</compile_context>

<pallas_src>
import math

import jax
import jax.numpy as jnp
from jax.experimental import pallas as pl
from jax.experimental.pallas import tpu as pltpu


def _chunk_rows(dtype):
    """Sublane-packing-sized channel chunk: one whole packed vreg per load."""
    itemsize = jnp.dtype(dtype).itemsize
    if itemsize >= 4:
        return 8
    if itemsize == 2:
        return 16
    return 32


def _vmem_capacity_bytes():
    """Physical VMEM per core; conservative (v7x-sized) fallback if unknown."""
    try:
        return int(pltpu.get_tpu_info().vmem_capacity_bytes)
    except Exception:
        return 64 * 1024 * 1024


def _per_buffer_target_bytes(vmem_cap):
    """Target bytes for ONE pipelined input buffer (2x double-buffered)."""
    if vmem_cap >= 100 * 1024 * 1024:   # v5e / v6e class: 128 MiB physical
        return 8 * 1024 * 1024
    return 4 * 1024 * 1024              # v7x class: 64 MiB physical


def _pick_spatial_tile(HW, C, elem_bytes, N, vmem_cap):
    """Pick THW so a (C, THW) input buffer is ~4-8 MiB (generation-aware),
    THW is a multiple of 128 (or the full spatial extent), and the grid keeps
    >= ~4 steps so v7x can shard across both TensorCores."""
    per_buf = _per_buffer_target_bytes(vmem_cap)
    max_lanes = per_buf // max(C * elem_bytes, 1)
    thw = max(128, (max_lanes // 128) * 128)
    if thw >= HW:
        thw = HW  # full-extent block along the spatial axis (always legal)
    # Back off if the grid would collapse to too few steps (matters on v7x,
    # which has 2 TensorCores; harmless elsewhere).
    while N * pl.cdiv(HW, thw) < 4 and thw > 512:
        thw = max(512, ((thw // 2) // 128) * 128)
    return thw


def spatial_attention_kernel(w_ref, x_ref, o_ref):
    # w_ref: (2,) f32 SMEM -- [w_avg / C, w_max] (1/C pre-folded by wrapper)
    # x_ref: (C, THW) VMEM tile of the current (batch, spatial-tile) block
    # o_ref: (1, THW) VMEM output tile
    C = x_ref.shape[0]

    # Hoist scalar SMEM reads out of the hot path.
    w0c = w_ref[0]
    w1 = w_ref[1]

    chunk = min(_chunk_rows(x_ref.dtype), C)
    n_full = C // chunk
    rem = C - n_full * chunk

    # First full chunk initializes the slab accumulators.
    x0 = x_ref[pl.ds(0, chunk), :]
    sum_slab = x0.astype(jnp.float32)   # f32 sum accumulator, (chunk, THW)
    max_slab = x0                       # running max stays in the input dtype

    if n_full > 1:
        if n_full > 16:
            # Large C: lightly-unrolled fori_loop keeps code size bounded
            # while preserving LLO scheduling visibility.
            def body(i, carry):
                s, m = carry
                start = pl.multiple_of(i * chunk, chunk)
                xc = x_ref[pl.ds(start, chunk), :]
                return s + xc.astype(jnp.float32), jnp.maximum(m, xc)

            sum_slab, max_slab = jax.lax.fori_loop(
                1, n_full, body, (sum_slab, max_slab), unroll=4)
        else:
            for j in range(1, n_full):  # small C: static unroll
                xc = x_ref[pl.ds(j * chunk, chunk), :]
                sum_slab = sum_slab + xc.astype(jnp.float32)
                max_slab = jnp.maximum(max_slab, xc)

    # Single cross-sublane (XLU) reduction per tile instead of per chunk.
    run_sum = jnp.sum(sum_slab, axis=0, keepdims=True)                      # (1, THW) f32
    run_max = jnp.max(max_slab, axis=0, keepdims=True).astype(jnp.float32)  # (1, THW) f32

    if rem > 0:  # remainder rows when C % chunk != 0
        xr = x_ref[pl.ds(n_full * chunk, rem), :]
        run_sum = run_sum + jnp.sum(xr.astype(jnp.float32), axis=0, keepdims=True)
        run_max = jnp.maximum(
            run_max, jnp.max(xr, axis=0, keepdims=True).astype(jnp.float32))

    # 1x1 conv over the [avg, max] 2-channel concat == w0*mean + w1*max,
    # with 1/C already folded into w0c.
    logits = w0c * run_sum + w1 * run_max
    o_ref[...] = jax.nn.sigmoid(logits).astype(o_ref.dtype)


def spatial_attention(x, conv_weight):
    """x: (N, C, H, W); conv_weight: (1, 2, 1, 1). Returns (N, 1, H, W)."""
    N, C, H, W = x.shape
    HW = H * W
    x2 = x.reshape(N, C, HW)  # keep caller dtype on the wire (bf16 stays bf16)

    w = conv_weight.reshape(2).astype(jnp.float32)
    # Fold 1/C into the avg-branch weight so the kernel only needs a sum.
    w_folded = jnp.stack([w[0] / jnp.float32(C), w[1]])

    in_itemsize = jnp.dtype(x.dtype).itemsize
    vmem_cap = _vmem_capacity_bytes()
    thw = _pick_spatial_tile(HW, C, in_itemsize, N, vmem_cap)
    grid = (N, pl.cdiv(HW, thw))  # padded last tile; OOB output writes dropped

    # Bandwidth-heavy custom call: tell XLA so it can schedule around it.
    cost = pl.CostEstimate(
        flops=3 * N * C * HW,
        transcendentals=N * HW,
        bytes_accessed=N * C * HW * in_itemsize + N * HW * in_itemsize + 8,
    )

    # Scoped VMEM: enough for double-buffered input + output tiles + headroom,
    # capped well under physical VMEM (v7x is only 64 MiB).
    needed = 2 * C * thw * in_itemsize + 2 * thw * in_itemsize + (4 << 20)
    vmem_limit = int(min(max(needed, 16 << 20), (vmem_cap * 3) // 4))

    out = pl.pallas_call(
        spatial_attention_kernel,
        out_shape=jax.ShapeDtypeStruct((N, 1, HW), x.dtype),
        grid=grid,
        in_specs=[
            pl.BlockSpec(memory_space=pltpu.MemorySpace.SMEM),              # folded weights
            pl.BlockSpec((pl.Squeezed(), C, thw), lambda n, s: (n, 0, s)),  # x tile
        ],
        out_specs=pl.BlockSpec((pl.Squeezed(), 1, thw), lambda n, s: (n, 0, s)),
        compiler_params=pltpu.CompilerParams(
            dimension_semantics=("parallel", "parallel"),
            vmem_limit_bytes=vmem_limit),
        cost_estimate=cost,
    )(w_folded, x2)
    return out.reshape(N, 1, H, W)


def reference(x, conv_weight):
    avg_out = jnp.mean(x, axis=1, keepdims=True)
    max_out = jnp.max(x, axis=1, keepdims=True)
    cat = jnp.concatenate([avg_out, max_out], axis=1)      # (N, 2, H, W)
    conv = jnp.einsum("nchw,oc->nohw", cat, conv_weight.reshape(1, 2))
    return jax.nn.sigmoid(conv)


if __name__ == "__main__":
    key = jax.random.PRNGKey(0)
    kx, kw, kx2 = jax.random.split(key, 3)

    # Deterministic Conv2d(2, 1, kernel_size=1, bias=False) weight init
    # (kaiming-uniform-style bound: 1/sqrt(fan_in), fan_in = 2*1*1).
    bound = 1.0 / math.sqrt(2.0)
    conv_weight = jax.random.uniform(
        kw, (1, 2, 1, 1), dtype=jnp.float32, minval=-bound, maxval=bound)

    # Primary shape (module-scale): exercises the small-C static-unroll path.
    N, C, H, W = 2, 4, 16, 16
    x = jax.random.normal(kx, (N, C, H, W), dtype=jnp.float32)
    out = jax.block_until_ready(spatial_attention(x, conv_weight))
    ref = reference(x, conv_weight)
    assert out.shape == (N, 1, H, W)
    assert jnp.allclose(out, ref, atol=1e-5, rtol=1e-5)

    # Secondary shape: exercises the fori_loop (large C) + remainder paths.
    N2, C2, H2, W2 = 1, 203, 8, 16
    x2 = jax.random.normal(kx2, (N2, C2, H2, W2), dtype=jnp.float32)
    out2 = jax.block_until_ready(spatial_attention(x2, conv_weight))
    ref2 = reference(x2, conv_weight)
    assert out2.shape == (N2, 1, H2, W2)
    assert jnp.allclose(out2, ref2, atol=1e-5, rtol=1e-5)

    print("KERNEL_OK")
</pallas_src>

<mosaic_0001>
module attributes {stable_mosaic.version = 11 : i64} {
  func.func @spatial_attention_kernel(%arg0: i32, %arg1: i32, %arg2: memref<2xf32, #tpu.memory_space<smem>>, %arg3: memref<1x4x256xf32, #tpu.memory_space<vmem>>, %arg4: memref<1x1x256xf32, #tpu.memory_space<vmem>>) attributes {dimension_semantics = [#tpu.dimension_semantics<parallel>, #tpu.dimension_semantics<parallel>], iteration_bounds = array<i64: 2, 1>, scalar_prefetch = 0 : i64, scratch_operands = 0 : i64, tpu.core_type = #tpu.core_type<tc>, window_params = [{transform_indices = @transform_0, window_bounds = array<i64: 2>}, {transform_indices = @transform_1, window_bounds = array<i64: 1, 4, 256>}, {transform_indices = @transform_2, window_bounds = array<i64: 1, 1, 256>}]} {
    %c0 = arith.constant 0 : index
    %0 = memref.load %arg2[%c0] : memref<2xf32, #tpu.memory_space<smem>>
    %c1 = arith.constant 1 : index
    %1 = memref.load %arg2[%c1] : memref<2xf32, #tpu.memory_space<smem>>
    %c0_0 = arith.constant 0 : index
    %c0_1 = arith.constant 0 : index
    %c0_2 = arith.constant 0 : index
    %2 = vector.load %arg3[%c0_0, %c0_1, %c0_2] : memref<1x4x256xf32, #tpu.memory_space<vmem>>, vector<1x4x256xf32>
    %3 = vector.shape_cast %2 : vector<1x4x256xf32> to vector<4x256xf32>
    %cst = arith.constant dense<0.000000e+00> : vector<256xf32>
    %4 = vector.multi_reduction <add>, %3, %cst [0] : vector<4x256xf32> to vector<256xf32>
    %5 = vector.shape_cast %4 : vector<256xf32> to vector<1x256xf32>
    %cst_3 = arith.constant dense<0xFF800000> : vector<256xf32>
    %6 = vector.multi_reduction <maximumf>, %3, %cst_3 [0] : vector<4x256xf32> to vector<256xf32>
    %7 = vector.shape_cast %6 : vector<256xf32> to vector<1x256xf32>
    %8 = vector.broadcast %0 : f32 to vector<1x256xf32>
    %9 = arith.mulf %8, %5 : vector<1x256xf32>
    %10 = vector.broadcast %1 : f32 to vector<1x256xf32>
    %11 = arith.mulf %10, %7 : vector<1x256xf32>
    %12 = arith.addf %9, %11 : vector<1x256xf32>
    %13 = arith.negf %12 : vector<1x256xf32>
    %14 = math.exp %13 : vector<1x256xf32>
    %cst_4 = arith.constant 1.000000e+00 : f32
    %15 = vector.broadcast %cst_4 : f32 to vector<1x256xf32>
    %16 = arith.addf %15, %14 : vector<1x256xf32>
    %17 = arith.divf %15, %16 : vector<1x256xf32>
    %c0_5 = arith.constant 0 : index
    %c0_6 = arith.constant 0 : index
    %c0_7 = arith.constant 0 : index
    %18 = vector.load %arg4[%c0_5, %c0_6, %c0_7] : memref<1x1x256xf32, #tpu.memory_space<vmem>>, vector<1x1x256xf32>
    %19 = vector.shape_cast %18 : vector<1x1x256xf32> to vector<1x256xf32>
    %20 = vector.shape_cast %17 : vector<1x256xf32> to vector<1x1x256xf32>
    tpu.vector_store %arg4[%c0_5, %c0_6, %c0_7], %20 {strides = array<i32>} : memref<1x1x256xf32, #tpu.memory_space<vmem>>, vector<1x1x256xf32>,
    return
  }
  func.func @transform_0(%arg0: i32, %arg1: i32) -> i32 {
    %c0_i32 = arith.constant 0 : i32
    %c0_i32_0 = arith.constant 0 : i32
    return %c0_i32 : i32
  }
  func.func @transform_1(%arg0: i32, %arg1: i32) -> (i32, i32, i32) {
    %c0_i32 = arith.constant 0 : i32
    %c0_i32_0 = arith.constant 0 : i32
    return %arg0, %c0_i32, %arg1 : i32, i32, i32
  }
  func.func @transform_2(%arg0: i32, %arg1: i32) -> (i32, i32, i32) {
    %c0_i32 = arith.constant 0 : i32
    %c0_i32_0 = arith.constant 0 : i32
    return %arg0, %c0_i32, %arg1 : i32, i32, i32
  }
}

</mosaic_0001>

<bundles_post_ra>
// kernel: tpu_custom_call.1
= control target key start
LH: loop header
LB: loop body
LE: loop exit
PB: predicated region body
PF: predicated region fallthrough
CT: control target
= control target key end

     0   :  { %7 = vsyncpa [#allocation5], 0  ;;  %s865_s0 = inlined_call_operand.hbm [shape: f32[2], index: 0, kind: input, shape index: {}]   ;;  %s866_s1 = inlined_call_operand.hbm [shape: f32[2,4,256], index: 1, kind: input, shape index: {}]   ;;  %s867_s2 = inlined_call_operand.hbm [shape: f32[2,1,256], index: 2, kind: output, shape index: {}]  }
   0x1   :  { %8 = vsyncpa [#allocation3], 0 }
   0x2   :  { %10 = vsyncpa [#allocation3 + $0x1], 0 }
   0x3   :  { %11 = vsyncpa [#allocation4], 0 }
   0x4   :  { %13 = vsyncpa [#allocation4 + $0x1], 0  ;;  %s638_s9 = smov 0   ;;  %s640_s10 = smov 0  }
   0x5   :  { %s642_s11 = smov 0   ;;  %s644_s12 = smov 0  }
   0x6   :  { %s646_s13 = smov 0   ;;  %s648_s14 = smov 0  }
   0x7 LB: > { %s383_s15 = sadd.s32 4294967295, %s617_s14   ;;  %s384_s16 = sadd.s32 4294967294, %s617_s14   ;;  %s617_s14 = sphi %s648_s14, %s19_s14   ;;  %s613_s13 = sphi %s646_s13, %s891_s13   ;;  %s609_s12 = sphi %s644_s12, %s890_s12   ;;  %s605_s11 = sphi %s642_s11, %s889_s11   ;;  %s601_s10 = sphi %s640_s10, %s888_s10   ;;  %s597_s9 = sphi %s638_s9, %s887_s9  }
   0x8   : > { %p74_p0 = scmp.ne.s32.totalorder %s601_s10, %s597_s9  ;;  %p672_p1 = scmp.eq.s32.totalorder %s383_s15, 0 }
   0x9   : > { %p676_p2 = scmp.eq.s32.totalorder %s383_s15, 1  ;;  %p106_p3 = scmp.eq.s32.totalorder %s384_s16, 1 }
   0xa   : > { %s872_s17 = scalar_select %p672_p1, 1, 0 }
   0xb   : > { %p682_p4 = por %p672_p1, %p74_p0  ;;  %p385_p5 = scmp.ge.s32.totalorder %s617_s14, 1 }
   0xc   : > { %p687_p6 = por %p106_p3, %p74_p0  ;;  %p113_p7 = scmp.lt.s32.totalorder %s617_s14, 3 }
   0xd   : > { %s874_s19 = scalar_select %p682_p4, 1, 0 }
   0xe   : > { %s875_s20 = scalar_select %p687_p6, 1, 0 }
   0xf   : > { %p692_p8 = pnand %p385_p5, %p113_p7  ;;  %s31_s22 = sadd.s32 1, %s613_s13 }
  0x10   : > { %p706_p12 = scmp.ge.s32.totalorder %s31_s22, 2  ;;  %s61_s25 = sadd.s32 1, %s605_s11 }
  0x11   : > { %p413_p10 = pneg %p692_p8  ;;  %p68_p13 = scmp.ne.s32.totalorder %s605_s11, %s601_s10 }
  0x12   : > { %p69_p0 = scmp.eq.s32.totalorder %s617_s14, 0  ;;  %s488_s28 = scalar_lea.hbm %s865_s0, 16 }
  0x13   : > { %p702_p11 = pnand %p413_p10, %p672_p1  ;;  %p489_p3 = scmp.ne.s32.totalorder %s865_s0, %s488_s28 }
  0x14   : > { %p495_p9 = scmp.lt.u32.totalorder %s488_s28, %s865_s0 }
  0x15   : > { %p490_p5 = pneg %p702_p11 }
  0x17   : > { %p491_p7 = pnand %p490_p5, %p489_p3 }
  0x19   : > { %p492_p10 = pneg %p491_p7 }
  0x1b   : > { %p497_p6 = pnand %p495_p9, %p492_p10 }
  0x1d   : > { %500 = shalt.err (!%p497_p6)
}
  0x1e   : > { %s619_s5 = smov [#allocation2]   ;;  %s893_s22 = smov (%p706_p12, %s31_s22), 0 }
  0x1f   : > { %416 = dma.hbm_to_smem (!%p702_p11), %s865_s0, 16, %s619_s5, [#allocation5]  }
  0x20   : > { %p737_p6 = por %p69_p0, %p68_p13  ;;  %p746_p9 = por %p676_p2, %p68_p13 }
  0x21   : > { %s56_s16 = ssub.s32 %s613_s13, %s893_s22  ;;  %p426_p3 = scmp.lt.s32.totalorder %s617_s14, 2 }
  0x22   : > { %s880_s15 = scalar_select %p746_p9, 1, 0 }
  0x23   : > { %p59_p5 = scmp.eq.s32.totalorder %s56_s16, 0  ;;  %s135_s23 = sand.u32 1, %s605_s11  }
  0x24   : > { %s388_s24 = sshll.u32 %s135_s23, 3  ;;  %s403_s27 = sshll.u32 %s613_s13, 7 }
  0x25   : > { %s755_s26 = scalar_select %p59_p5, %s605_s11, %s61_s25  }
  0x26   : > { %s761_s30 = scalar_lea.hbm %s866_s1, %s403_s27  ;;  %s139_s18 = scalar_lea.vmem [#allocation6], %s388_s24 }
  0x27   : > { %s149_s3 = sshll.u32 %s139_s18, 4  ;;  %p767_p2 = pnand %p426_p3, %p737_p6  ;;  %s763_s3 = int_to_ptr.vmem [resolvable:$true] %s149_s3 }
  0x28   : > { %s136_s25 = scalar_lea.sflag [#allocation3], %s135_s23  ;;  %s501_s5 = scalar_lea.hbm %s761_s30, 128 }
  0x29   : > { %p502_p11 = scmp.ne.s32.totalorder %s761_s30, %s501_s5  ;;  %p503_p12 = pneg %p767_p2 }
  0x2a   : > { %s506_s16 = scalar_lea.hbm %s866_s1, 256  ;;  %p507_p7 = scmp.lt.u32.totalorder %s761_s30, %s866_s1 }
  0x2b   : > { %p504_p13 = pnand %p503_p12, %p502_p11  ;;  %p508_p10 = scmp.lt.u32.totalorder %s506_s16, %s501_s5 }
  0x2c   : > { %p510_p3 = scmp.lt.u32.totalorder %s501_s5, %s761_s30 }
  0x2d   : > { %p505_p0 = pneg %p504_p13  ;;  %p509_p6 = por %p508_p10, %p507_p7 }
  0x2f   : > { %p511_p5 = por %p510_p3, %p509_p6 }
  0x31   : > { %p512_p9 = pnand %p511_p5, %p505_p0 }
  0x33   : > { %515 = shalt.err (!%p512_p9)
}
  0x34   : > { %s516_s23 = scalar_lea.vmem %s763_s3, 128  ;;  %s620_s27 = smov [#allocation6]  }
  0x35   : > { %p517_p11 = scmp.ne.s32.totalorder %s763_s3, %s516_s23  ;;  %s521_s28 = sshll.u32 %s620_s27, 4  ;;  %s522_s28 = int_to_ptr.vmem [resolvable:$false] %s521_s28 }
  0x36   : > { %s523_s29 = scalar_lea.vmem %s522_s28, 256  ;;  %p524_p1 = scmp.lt.s32.totalorder %s763_s3, %s522_s28 }
  0x37   : > { %p519_p13 = pnand %p517_p11, %p503_p12  ;;  %p525_p7 = scmp.lt.s32.totalorder %s523_s29, %s516_s23 }
  0x39   : > { %p520_p4 = pneg %p519_p13  ;;  %p526_p10 = por %p525_p7, %p524_p1 }
  0x3b   : > { %p527_p6 = pnand %p526_p10, %p520_p4 }
  0x3d   : > { %530 = shalt.err (!%p527_p6)
}
  0x3e   : > { %420 = dma.hbm_to_vmem [thread:$0]  (!%p767_p2), %s761_s30, 128, %s763_s3, %s136_s25  }
  0x3f   : > { %158 = sbr.rel (%p692_p8) target bundleno = 143 (0x8f), region = 28  ;;  %p882_p9 = scmp.ne.s32.totalorder (!%p692_p8), %s872_s17, 0 }
  0x46   : > { %584 = dma.done.wait (%p882_p9), [#allocation5], 16  }
  0x47   : > { %586 = vsyncadd (%p882_p9), [#allocation5], 4294967280  ;;  %s803_s18 = sand.u32 1, %s601_s10   ;;  %p883_p1 = scmp.ne.s32.totalorder %s874_s19, 0 }
  0x48   : > { %s393_s5 = sshll.u32 %s803_s18, 3  ;;  %s165_s4 = scalar_lea.sflag [#allocation3], %s803_s18 }
  0x49   : > { %s168_s6 = scalar_lea.vmem [#allocation6], %s393_s5 }
  0x4a   : > { %588 = dma.done.wait (%p883_p1), %s165_s4, 128  }
  0x4b   : > { %590 = vsyncadd (%p883_p1), %s165_s4, 4294967168 }
  0x4c   : > { %173 = sfence }
  0x4d   : > { %v194_v0 = vld [vmem:[%s168_s6] sm:$0xff]  ;;  %vm198_vm0 = vcmask 1043456   ;;  %s192_s17 = sld [smem:[#allocation2]]  ;;  %s395_s21 = sld [smem:[#allocation2 + $0x1]]  ;;  %v621_v44 = vmov 1966171168   ;;  %v253_v46 = vlaneseq }
  0x4e   : > { %v196_v1 = vcombine.high %v194_v0, %v194_v0  ;;  %v199_v2 = vsel %vm198_vm0, %v194_v0, 0.0  ;;  %v213_v3 = vsel %vm198_vm0, %v194_v0, -inf  ;;  %v251_v45 = vunpack.c.l.s4 %v621_v44  ;;  %s394_s19 = sshll.u32 %s803_s18, 1  ;;  %s404_s25 = sshll.u32 %s609_s12, 5 }
  0x4f   : > { %v200_v4 = vrot.slane %v199_v2, 4  ;;  %v214_v5 = vrot.slane %v213_v3, 4  ;;  %v254_v48 = vshrl.u32 %v253_v46, 7  ;;  %s189_s30 = scalar_lea.vmem [#allocation7], %s394_s19  ;;  %vm267_vm1 = vcmp.lt.s32.totalorder %v253_v46, 256  ;;  %s818_s8 = scalar_lea.hbm %s867_s2, %s404_s25 }
  0x50   : > { %v206_v6 = vsel %vm198_vm0, %v196_v1, 0.0  ;;  %v220_v7 = vsel %vm198_vm0, %v196_v1, -inf  ;;  %v252_v47 = vunpack.c.0.s8 %v251_v45  ;;  %s287_s3 = sshll.u32 %s189_s30, 4  ;;  %s271_s24 = scalar_lea.sflag [#allocation4], %s803_s18  ;;  %s813_s3 = int_to_ptr.vmem [resolvable:$true] %s287_s3 }
  0x51   : > { %v201_v8 = vadd.f32 %v200_v4, %v199_v2  ;;  %v207_v9 = vrot.slane %v206_v6, 4  ;;  %v215_v10 = vmax.f32 %v213_v3, %v214_v5  ;;  %v221_v11 = vrot.slane %v220_v7, 4  ;;  %s531_s23 = scalar_lea.vmem %s813_s3, 32  ;;  %p884_p8 = scmp.ne.s32.totalorder %s880_s15, 0 }
  0x52   : > { %v255_v50 = vsub.s32 %v252_v47, %v254_v48  ;;  %p532_p4 = scmp.ne.s32.totalorder %s813_s3, %s531_s23  ;;  %s622_s12 = smov [#allocation7]  }
  0x53   : > { %v202_v12 = vrot.slane %v201_v8, 2  ;;  %v208_v13 = vadd.f32 %v207_v9, %v206_v6  ;;  %v216_v14 = vrot.slane %v215_v10, 2  ;;  %v222_v15 = vmax.f32 %v220_v7, %v221_v11  ;;  %s535_s27 = sshll.u32 %s622_s12, 4  ;;  %s536_s27 = int_to_ptr.vmem [resolvable:$false] %s535_s27 }
  0x54   : > { %v227_v24 = vstv %s192_s17  ;;  %v230_v25 = vstv %s395_s21  ;;  %p533_p2 = pnand %p532_p4, %p884_p8  ;;  %s537_s28 = scalar_lea.vmem %s536_s27, 64 }
  0x55   : > { %v203_v16 = vadd.f32 %v202_v12, %v201_v8  ;;  %v209_v17 = vrot.slane %v208_v13, 2  ;;  %v217_v18 = vmax.f32 %v215_v10, %v216_v14  ;;  %v223_v19 = vrot.slane %v222_v15, 2  ;;  %p538_p0 = scmp.lt.s32.totalorder %s813_s3, %s536_s27  ;;  %p539_p3 = scmp.lt.s32.totalorder %s537_s28, %s531_s23 }
  0x56   : > { %p534_p12 = pneg %p533_p2 }
  0x57   : > { %v204_v20 = vrot.slane %v203_v16, 1  ;;  %v210_v21 = vadd.f32 %v209_v17, %v208_v13  ;;  %v218_v22 = vrot.slane %v217_v18, 1  ;;  %v224_v23 = vmax.f32 %v222_v15, %v223_v19  ;;  %p540_p5 = por %p539_p3, %p538_p0 }
  0x59   : > { %v205_v26 = vadd.f32 %v204_v20, %v203_v16  ;;  %v211_v27 = vrot.slane %v210_v21, 1  ;;  %v219_v28 = vmax.f32 %v217_v18, %v218_v22  ;;  %v225_v29 = vrot.slane %v224_v23, 1  ;;  %p541_p11 = pnand %p540_p5, %p534_p12 }
  0x5b   : > { %v212_v30 = vadd.f32 %v211_v27, %v210_v21  ;;  %v226_v31 = vmax.f32 %v224_v23, %v225_v29  ;;  %v228_v32 = vmul.f32 %v227_v24, %v205_v26  ;;  %v231_v33 = vmul.f32 %v230_v25, %v219_v28 }
  0x5d   : > { %v229_v34 = vmul.f32 %v227_v24, %v212_v30  ;;  %v232_v35 = vmul.f32 %v230_v25, %v226_v31  ;;  %v233_v36 = vadd.f32 %v231_v33, %v228_v32 }
  0x5f   : > { %v234_v37 = vadd.f32 %v232_v35, %v229_v34  ;;  %v396_v38 = vmul.f32 -1.442695, %v233_v36 }
  0x61   : > { %480 = vpow2.f32 %v396_v38  ;;  %v397_v39 = vmul.f32 -1.442695, %v234_v37 }
  0x63   : > { %482 = vpow2.f32 %v397_v39 }
  0x6b   : > { %v481_v40 = vpop.eup %480 }
  0x6c   : > { %v241_v41 = vadd.f32 1.0, %v481_v40 }
  0x6d   : > { %v483_v42 = vpop.eup %482 }
  0x6e   : > { %v242_v43 = vadd.f32 1.0, %v483_v42  ;;  %484 = vrcp.f32 %v241_v41 }
  0x70   : > { %486 = vrcp.f32 %v242_v43 }
  0x78   : > { %v485_v49 = vpop.eup %484 }
  0x7a   : > { %v487_v51 = vpop.eup %486 }
  0x7b   : > { %v249_v52 = vcombine.low %v485_v49, %v487_v51 }
  0x7d   : > { %v256_v53 = vrot.slane %v249_v52, %v255_v50 }
  0x7f   : > { %v263_v54 = vrot.slane %v256_v53, %v255_v50 }
  0x81   : > { %269 = vst.msk [vmem:[%s189_s30] sm:$0x3] %vm267_vm1, %v263_v54 }
  0x82   : > { %544 = shalt.err (!%p541_p11)
}
  0x83   : > { %s545_s29 = scalar_lea.hbm %s818_s8, 32  ;;  %s549_s4 = scalar_lea.hbm %s867_s2, 64 }
  0x84   : > { %p546_p13 = scmp.ne.s32.totalorder %s818_s8, %s545_s29  ;;  %p550_p6 = scmp.lt.u32.totalorder %s818_s8, %s867_s2 }
  0x85   : > { %p551_p9 = scmp.lt.u32.totalorder %s549_s4, %s545_s29  ;;  %p553_p4 = scmp.lt.u32.totalorder %s545_s29, %s818_s8 }
  0x86   : > { %p547_p7 = pnand %p546_p13, %p884_p8 }
  0x87   : > { %p552_p1 = por %p551_p9, %p550_p6 }
  0x88   : > { %p548_p10 = pneg %p547_p7 }
  0x89   : > { %p554_p2 = por %p553_p4, %p552_p1 }
  0x8b   : > { %p555_p12 = pnand %p554_p2, %p548_p10 }
  0x8d   : > { %558 = shalt.err (!%p555_p12)
}
  0x8e   : > { %411 = dma.vmem_to_hbm [thread:$0]  (%p884_p8), %s813_s3, 32, %s818_s8, %s271_s24  }
  0x8f PF: > { %s299_s21 = sand.u32 1, %s597_s9   ;;  %p885_p0 = scmp.ne.s32.totalorder %s875_s20, 0 }
  0x90   : > { %p886_p3 = scmp.ge.s32.totalorder %s617_s14, 2  ;;  %s300_s19 = scalar_lea.sflag [#allocation4], %s299_s21 }
  0x92   : > { %p422_p5 = pnand %p886_p3, %p885_p0 }
  0x94   : > { %592 = dma.done.wait (!%p422_p5), %s300_s19, 32  }
  0x95   : > { %594 = vsyncadd (!%p422_p5), %s300_s19, 4294967264  ;;  %s19_s14 = sadd.s32 1, %s617_s14   ;;  %s887_s9 = smov %s601_s10 }
  0x96   : > { %p16_p11 = scmp.ge.s32.totalorder %s19_s14, 4   ;;  %s888_s10 = smov %s605_s11 }
  0x97   : > { %s889_s11 = smov %s755_s26  ;;  %s890_s12 = smov %s613_s13 }
  0x98   : > { %s891_s13 = smov %s893_s22  ;;  %18 = sbr.rel (!%p16_p11) target bundleno = 7 (0x7), region = 78 }
  0x9f   :  { %305 = vsyncpa [#allocation3], 1 }
  0xa0   :  { %307 = vsyncpa [#allocation3 + $0x1], 1 }
  0xa1   :  { %308 = vsyncpa [#allocation4], 1 }
  0xa2   :  { %310 = vsyncpa [#allocation4 + $0x1], 1 }
  0xa3   :  { %311 = vsyncpa [#allocation5], 1 }
  0xa4   :  { %313 = vsyncpa [#allocation5 + $0x1], 1 }

</bundles_post_ra>
